<compile_context>
chip_gen: v6e
topology: v6e:2x2x1
jax: 0.10.0
libtpu: 0.0.40
codegen_flags: <defaults>
</compile_context>

<pallas_src>
import functools

import jax
import jax.numpy as jnp
from jax.experimental import pallas as pl
from jax.experimental.pallas import tpu as pltpu

_LANES = 128


def _round_up(x, m):
    return (x + m - 1) // m * m


def _accumulate_and_store(s, scores_ref, acc_ref, c, i, rows):
    """Store scores, add the row-masked tile sum into the per-lane accumulator."""
    block_rows = s.shape[0]
    tile_idx = c * pl.num_programs(1) + i          # UNclamped logical tile index
    # Rows at/after `rows` in this (partial or clamped-duplicate) block hold
    # garbage / duplicate data; zero them in the accumulation.  Stores past the
    # array end are dropped by the DMA, so the store itself needs no mask.
    row_ids = jax.lax.broadcasted_iota(jnp.int32, (block_rows, _LANES), 0)
    valid = row_ids < (rows - tile_idx * block_rows)
    acc_ref[...] += jnp.sum(jnp.where(valid, s, 0.0), axis=0, keepdims=True)
    scores_ref[...] = s.astype(scores_ref.dtype)


def _mrl_kernel_unweighted(p_ref, n_ref, scores_ref, psum_ref, acc_ref,
                           *, margin, rows):
    c = pl.program_id(0)
    i = pl.program_id(1)

    @pl.when(i == 0)
    def _init():
        acc_ref[...] = jnp.zeros_like(acc_ref)

    p = p_ref[...].astype(jnp.float32)
    n = n_ref[...].astype(jnp.float32)
    s = jnp.maximum(margin + p - n, 0.0)
    _accumulate_and_store(s, scores_ref, acc_ref, c, i, rows)

    @pl.when(i == pl.num_programs(1) - 1)
    def _finalize():
        psum_ref[...] = jnp.sum(acc_ref[...]).reshape(1, 1, 1)


def _mrl_kernel_weighted(inv_wm_ref, p_ref, n_ref, w_ref, scores_ref, psum_ref,
                         acc_ref, *, margin, rows):
    c = pl.program_id(0)
    i = pl.program_id(1)

    @pl.when(i == 0)
    def _init():
        acc_ref[...] = jnp.zeros_like(acc_ref)

    p = p_ref[...].astype(jnp.float32)
    n = n_ref[...].astype(jnp.float32)
    w = w_ref[...].astype(jnp.float32)
    s = jnp.maximum(margin + p - n, 0.0) * (w * inv_wm_ref[0])
    _accumulate_and_store(s, scores_ref, acc_ref, c, i, rows)

    @pl.when(i == pl.num_programs(1) - 1)
    def _finalize():
        psum_ref[...] = jnp.sum(acc_ref[...]).reshape(1, 1, 1)


def margin_ranking_loss(p_enrgs, n_enrgs, margin, weights=None, *,
                        block_rows=2048):
    """Pallas implementation of MarginRankingLoss.forward.

    Returns (mean_scores, scores: (N,)), exactly like the PyTorch module's
    (scores.mean(), scores).
    """
    N = p_enrgs.shape[0]
    out_dtype = p_enrgs.dtype

    rows = pl.cdiv(N, _LANES)          # number of 128-element rows (lane-dense)
    padded_n = rows * _LANES
    pad = padded_n - N                 # only non-zero when N % 128 != 0

    # Tile choice: multiple of 8 rows, never larger than the problem itself
    # (block == full array dim is also a legal tiling).
    block_rows = min(max(8, _round_up(int(block_rows), 8)), rows)
    n_tiles = pl.cdiv(rows, block_rows)

    # Megacore split (v7x has 2 TensorCores; on v5e/v6e this axis is serial).
    G = 2 if n_tiles >= 2 else 1
    tpc = pl.cdiv(n_tiles, G)

    def _prep(x, fill):
        x = x.reshape(-1)
        if pad:
            # Ragged tail -> pad to the next 128 multiple.  Fill values make
            # the hinge exactly 0 on padded slots (-1e30 would be -inf in f16,
            # which still clamps to 0).
            x = jnp.pad(x, (0, pad), constant_values=fill)
        return x.reshape(rows, _LANES)

    p2 = _prep(p_enrgs, -1e30)   # margin + (-1e30) - 0 < 0  -> clamp -> 0
    n2 = _prep(n_enrgs, 0.0)

    def _block_idx(c, i):
        # Clamp overflow tiles (odd n_tiles with G=2) onto the last real tile;
        # their contribution to the sum is masked out in-kernel and their
        # (identical) store is harmless.
        return (jnp.minimum(c * tpc + i, n_tiles - 1), 0)

    tile_spec = pl.BlockSpec((block_rows, _LANES), _block_idx)
    psum_spec = pl.BlockSpec((1, 1, 1), lambda c, i: (c, 0, 0))
    out_shape = (
        jax.ShapeDtypeStruct((rows, _LANES), out_dtype),   # scores
        jax.ShapeDtypeStruct((G, 1, 1), jnp.float32),      # per-core partial sums
    )
    scratch = [pltpu.VMEM((1, _LANES), jnp.float32)]       # per-lane accumulator
    cparams = pltpu.CompilerParams(
        dimension_semantics=("parallel", "arbitrary"))

    if weights is not None:
        w2 = _prep(weights, 0.0)
        # NOTE: mean(weights) is one extra HBM pass over weights, but it is
        # required before any tile is written because the per-element
        # normalized scores are part of the module's return value.
        inv_wm = (1.0 / jnp.mean(weights.astype(jnp.float32))
                  ).astype(jnp.float32).reshape(1)
        kernel = functools.partial(_mrl_kernel_weighted,
                                   margin=float(margin), rows=rows)
        scores2, psums = pl.pallas_call(
            kernel,
            out_shape=out_shape,
            grid=(G, tpc),
            in_specs=[
                pl.BlockSpec(memory_space=pltpu.MemorySpace.SMEM),  # 1/mean(w)
                tile_spec, tile_spec, tile_spec,
            ],
            out_specs=(tile_spec, psum_spec),
            scratch_shapes=scratch,
            compiler_params=cparams,
        )(inv_wm, p2, n2, w2)
    else:
        kernel = functools.partial(_mrl_kernel_unweighted,
                                   margin=float(margin), rows=rows)
        scores2, psums = pl.pallas_call(
            kernel,
            out_shape=out_shape,
            grid=(G, tpc),
            in_specs=[tile_spec, tile_spec],
            out_specs=(tile_spec, psum_spec),
            scratch_shapes=scratch,
            compiler_params=cparams,
        )(p2, n2)

    mean = (jnp.sum(psums) / N).astype(out_dtype)
    scores = scores2.reshape(padded_n)
    if pad:
        scores = scores[:N]          # only copies when N % 128 != 0
    return mean, scores


def _reference(p, n, margin, weights=None):
    s = jnp.maximum(margin + p - n, 0.0)
    if weights is not None:
        s = s * weights / jnp.mean(weights)
    return jnp.mean(s), s


if __name__ == "__main__":
    key = jax.random.PRNGKey(0)
    k1, k2, k3 = jax.random.split(key, 3)

    margin = 1.0

    # Case 1: ragged tail (N % 128 != 0), single tile.  Weighted + unweighted.
    N = 1000
    p_enrgs = jax.random.normal(k1, (N,), dtype=jnp.float32)
    n_enrgs = jax.random.normal(k2, (N,), dtype=jnp.float32)
    weights = jax.random.uniform(k3, (N,), dtype=jnp.float32, minval=0.5, maxval=1.5)

    mean_w, scores_w = margin_ranking_loss(p_enrgs, n_enrgs, margin, weights)
    jax.block_until_ready((mean_w, scores_w))
    ref_mean_w, ref_scores_w = _reference(p_enrgs, n_enrgs, margin, weights)

    mean_u, scores_u = margin_ranking_loss(p_enrgs, n_enrgs, margin, None)
    jax.block_until_ready((mean_u, scores_u))
    ref_mean_u, ref_scores_u = _reference(p_enrgs, n_enrgs, margin, None)

    # Case 2: multi-tile, odd tile count -> exercises the 2-way split with a
    # clamped overflow tile and the in-kernel row masking of the accumulator.
    N2 = 5000
    p_m = jax.random.normal(k1, (N2,), dtype=jnp.float32)
    n_m = jax.random.normal(k2, (N2,), dtype=jnp.float32)
    w_m = jax.random.uniform(k3, (N2,), dtype=jnp.float32, minval=0.5, maxval=1.5)
    mean_m, scores_m = margin_ranking_loss(p_m, n_m, margin, w_m, block_rows=8)
    jax.block_until_ready((mean_m, scores_m))
    ref_mean_m, ref_scores_m = _reference(p_m, n_m, margin, w_m)

    # Case 3: N a multiple of 128 (no wrapper copies at all), even tile split.
    N3 = 2048
    p_e = jax.random.normal(k1, (N3,), dtype=jnp.float32)
    n_e = jax.random.normal(k2, (N3,), dtype=jnp.float32)
    mean_e, scores_e = margin_ranking_loss(p_e, n_e, margin, None, block_rows=8)
    jax.block_until_ready((mean_e, scores_e))
    ref_mean_e, ref_scores_e = _reference(p_e, n_e, margin, None)

    assert jnp.allclose(scores_w, ref_scores_w, atol=1e-5, rtol=1e-5)
    assert jnp.allclose(mean_w, ref_mean_w, atol=1e-5, rtol=1e-5)
    assert jnp.allclose(scores_u, ref_scores_u, atol=1e-5, rtol=1e-5)
    assert jnp.allclose(mean_u, ref_mean_u, atol=1e-5, rtol=1e-5)
    assert jnp.allclose(scores_m, ref_scores_m, atol=1e-5, rtol=1e-5)
    assert jnp.allclose(mean_m, ref_mean_m, atol=1e-5, rtol=1e-5)
    assert jnp.allclose(scores_e, ref_scores_e, atol=1e-5, rtol=1e-5)
    assert jnp.allclose(mean_e, ref_mean_e, atol=1e-5, rtol=1e-5)

    print("KERNEL_OK")
</pallas_src>

<mosaic_0001>
module attributes {stable_mosaic.version = 11 : i64} {
  func.func @_mrl_kernel_weighted(%arg0: i32, %arg1: i32, %arg2: memref<1xf32, #tpu.memory_space<smem>>, %arg3: memref<8x128xf32, #tpu.memory_space<vmem>>, %arg4: memref<8x128xf32, #tpu.memory_space<vmem>>, %arg5: memref<8x128xf32, #tpu.memory_space<vmem>>, %arg6: memref<8x128xf32, #tpu.memory_space<vmem>>, %arg7: memref<1x1x1xf32, #tpu.memory_space<vmem>>, %arg8: memref<1x128xf32, #tpu.memory_space<vmem>>) attributes {dimension_semantics = [#tpu.dimension_semantics<parallel>, #tpu.dimension_semantics<arbitrary>], iteration_bounds = array<i64: 1, 1>, scalar_prefetch = 0 : i64, scratch_operands = 1 : i64, tpu.core_type = #tpu.core_type<tc>, window_params = [{transform_indices = @transform_0, window_bounds = array<i64: 1>}, {transform_indices = @transform_1, window_bounds = array<i64: 8, 128>}, {transform_indices = @transform_2, window_bounds = array<i64: 8, 128>}, {transform_indices = @transform_3, window_bounds = array<i64: 8, 128>}, {transform_indices = @transform_4, window_bounds = array<i64: 8, 128>}, {transform_indices = @transform_5, window_bounds = array<i64: 1, 1, 1>}]} {
    %c0_i32 = arith.constant 0 : i32
    %0 = arith.cmpi eq, %arg1, %c0_i32 : i32
    %1 = arith.extui %0 : i1 to i32
    %c0_i32_0 = arith.constant 0 : i32
    %2 = arith.cmpi ne, %1, %c0_i32_0 : i32
    scf.if %2 {
      %cst_19 = arith.constant 0.000000e+00 : f32
      %33 = vector.broadcast %cst_19 : f32 to vector<1x128xf32>
      %c0_20 = arith.constant 0 : index
      %c0_21 = arith.constant 0 : index
      %34 = vector.load %arg8[%c0_20, %c0_21] : memref<1x128xf32, #tpu.memory_space<vmem>>, vector<1x128xf32>
      tpu.vector_store %arg8[%c0_20, %c0_21], %33 {strides = array<i32>} : memref<1x128xf32, #tpu.memory_space<vmem>>, vector<1x128xf32>,
    } else {
    }
    %c0 = arith.constant 0 : index
    %c0_1 = arith.constant 0 : index
    %3 = vector.load %arg3[%c0, %c0_1] : memref<8x128xf32, #tpu.memory_space<vmem>>, vector<8x128xf32>
    %c0_2 = arith.constant 0 : index
    %c0_3 = arith.constant 0 : index
    %4 = vector.load %arg4[%c0_2, %c0_3] : memref<8x128xf32, #tpu.memory_space<vmem>>, vector<8x128xf32>
    %c0_4 = arith.constant 0 : index
    %c0_5 = arith.constant 0 : index
    %5 = vector.load %arg5[%c0_4, %c0_5] : memref<8x128xf32, #tpu.memory_space<vmem>>, vector<8x128xf32>
    %cst = arith.constant 1.000000e+00 : f32
    %6 = vector.broadcast %cst : f32 to vector<8x128xf32>
    %7 = arith.addf %6, %3 : vector<8x128xf32>
    %8 = arith.subf %7, %4 : vector<8x128xf32>
    %cst_6 = arith.constant 0.000000e+00 : f32
    %9 = vector.broadcast %cst_6 : f32 to vector<8x128xf32>
    %10 = arith.maximumf %8, %9 : vector<8x128xf32>
    %c0_7 = arith.constant 0 : index
    %11 = memref.load %arg2[%c0_7] : memref<1xf32, #tpu.memory_space<smem>>
    %12 = vector.broadcast %11 : f32 to vector<8x128xf32>
    %13 = arith.mulf %5, %12 : vector<8x128xf32>
    %14 = arith.mulf %10, %13 : vector<8x128xf32>
    %c1_i32 = arith.constant 1 : i32
    %15 = arith.muli %arg0, %c1_i32 : i32
    %16 = arith.addi %15, %arg1 : i32
    %17 = tpu.iota {dimensions = array<i32: 0>} : vector<8x128xi32>
    %c8_i32 = arith.constant 8 : i32
    %18 = arith.muli %16, %c8_i32 : i32
    %c8_i32_8 = arith.constant 8 : i32
    %19 = arith.subi %c8_i32_8, %18 : i32
    %20 = vector.broadcast %19 : i32 to vector<8x128xi32>
    %21 = arith.cmpi slt, %17, %20 : vector<8x128xi32>
    %c0_9 = arith.constant 0 : index
    %c0_10 = arith.constant 0 : index
    %22 = vector.load %arg8[%c0_9, %c0_10] : memref<1x128xf32, #tpu.memory_space<vmem>>, vector<1x128xf32>
    %cst_11 = arith.constant 0.000000e+00 : f32
    %23 = vector.broadcast %cst_11 : f32 to vector<8x128xf32>
    %24 = arith.select %21, %14, %23 : vector<8x128xi1>, vector<8x128xf32>
    %cst_12 = arith.constant dense<0.000000e+00> : vector<128xf32>
    %25 = vector.multi_reduction <add>, %24, %cst_12 [0] : vector<8x128xf32> to vector<128xf32>
    %26 = vector.shape_cast %25 : vector<128xf32> to vector<1x128xf32>
    %27 = arith.addf %22, %26 : vector<1x128xf32>
    %c0_13 = arith.constant 0 : index
    %c0_14 = arith.constant 0 : index
    %28 = vector.load %arg8[%c0_13, %c0_14] : memref<1x128xf32, #tpu.memory_space<vmem>>, vector<1x128xf32>
    tpu.vector_store %arg8[%c0_13, %c0_14], %27 {strides = array<i32>} : memref<1x128xf32, #tpu.memory_space<vmem>>, vector<1x128xf32>,
    %c0_15 = arith.constant 0 : index
    %c0_16 = arith.constant 0 : index
    %29 = vector.load %arg6[%c0_15, %c0_16] : memref<8x128xf32, #tpu.memory_space<vmem>>, vector<8x128xf32>
    tpu.vector_store %arg6[%c0_15, %c0_16], %14 {strides = array<i32>} : memref<8x128xf32, #tpu.memory_space<vmem>>, vector<8x128xf32>,
    %c0_i32_17 = arith.constant 0 : i32
    %30 = arith.cmpi eq, %arg1, %c0_i32_17 : i32
    %31 = arith.extui %30 : i1 to i32
    %c0_i32_18 = arith.constant 0 : i32
    %32 = arith.cmpi ne, %31, %c0_i32_18 : i32
    scf.if %32 {
      %c0_19 = arith.constant 0 : index
      %c0_20 = arith.constant 0 : index
      %33 = vector.load %arg8[%c0_19, %c0_20] : memref<1x128xf32, #tpu.memory_space<vmem>>, vector<1x128xf32>
      %34 = vector.shape_cast %33 : vector<1x128xf32> to vector<1x1x128xf32>
      %cst_21 = arith.constant dense<0.000000e+00> : vector<1xf32>
      %35 = vector.multi_reduction <add>, %34, %cst_21 [1, 2] : vector<1x1x128xf32> to vector<1xf32>
      %36 = vector.shape_cast %35 : vector<1xf32> to vector<1x1x1xf32>
      %37 = vector.extract %36[0, 0, 0] : f32 from vector<1x1x1xf32>
      %38 = vector.broadcast %37 : f32 to vector<1x1x1xf32>
      %c0_22 = arith.constant 0 : index
      %c0_23 = arith.constant 0 : index
      %c0_24 = arith.constant 0 : index
      %39 = vector.load %arg7[%c0_22, %c0_23, %c0_24] : memref<1x1x1xf32, #tpu.memory_space<vmem>>, vector<1x1x1xf32>
      tpu.vector_store %arg7[%c0_22, %c0_23, %c0_24], %38 {strides = array<i32>} : memref<1x1x1xf32, #tpu.memory_space<vmem>>, vector<1x1x1xf32>,
    } else {
    }
    return
  }
  func.func @transform_0(%arg0: i32, %arg1: i32) -> i32 {
    %c0_i32 = arith.constant 0 : i32
    %c0_i32_0 = arith.constant 0 : i32
    return %c0_i32 : i32
  }
  func.func @transform_1(%arg0: i32, %arg1: i32) -> (i32, i32) {
    %c1_i32 = arith.constant 1 : i32
    %0 = arith.muli %arg0, %c1_i32 : i32
    %1 = arith.addi %0, %arg1 : i32
    %c0_i32 = arith.constant 0 : i32
    %2 = arith.minsi %1, %c0_i32 : i32
    %c0_i32_0 = arith.constant 0 : i32
    %c0_i32_1 = arith.constant 0 : i32
    return %2, %c0_i32_0 : i32, i32
  }
  func.func @transform_2(%arg0: i32, %arg1: i32) -> (i32, i32) {
    %c1_i32 = arith.constant 1 : i32
    %0 = arith.muli %arg0, %c1_i32 : i32
    %1 = arith.addi %0, %arg1 : i32
    %c0_i32 = arith.constant 0 : i32
    %2 = arith.minsi %1, %c0_i32 : i32
    %c0_i32_0 = arith.constant 0 : i32
    %c0_i32_1 = arith.constant 0 : i32
    return %2, %c0_i32_0 : i32, i32
  }
  func.func @transform_3(%arg0: i32, %arg1: i32) -> (i32, i32) {
    %c1_i32 = arith.constant 1 : i32
    %0 = arith.muli %arg0, %c1_i32 : i32
    %1 = arith.addi %0, %arg1 : i32
    %c0_i32 = arith.constant 0 : i32
    %2 = arith.minsi %1, %c0_i32 : i32
    %c0_i32_0 = arith.constant 0 : i32
    %c0_i32_1 = arith.constant 0 : i32
    return %2, %c0_i32_0 : i32, i32
  }
  func.func @transform_4(%arg0: i32, %arg1: i32) -> (i32, i32) {
    %c1_i32 = arith.constant 1 : i32
    %0 = arith.muli %arg0, %c1_i32 : i32
    %1 = arith.addi %0, %arg1 : i32
    %c0_i32 = arith.constant 0 : i32
    %2 = arith.minsi %1, %c0_i32 : i32
    %c0_i32_0 = arith.constant 0 : i32
    %c0_i32_1 = arith.constant 0 : i32
    return %2, %c0_i32_0 : i32, i32
  }
  func.func @transform_5(%arg0: i32, %arg1: i32) -> (i32, i32, i32) {
    %c0_i32 = arith.constant 0 : i32
    %c0_i32_0 = arith.constant 0 : i32
    %c0_i32_1 = arith.constant 0 : i32
    return %arg0, %c0_i32, %c0_i32_0 : i32, i32, i32
  }
}

</mosaic_0001>

<bundles_post_ra>
// kernel: tpu_custom_call.1
= control target key start
LH: loop header
LB: loop body
LE: loop exit
PB: predicated region body
PF: predicated region fallthrough
CT: control target
= control target key end

     0   :  { %12 = vsyncpa [#allocation5], 0  ;;  %s348_s0 = inlined_call_operand.<no memory space> [shape: f32[1], index: 0, kind: input, shape index: {}]   ;;  %s349_s1 = inlined_call_operand.hbm [shape: f32[8,128], index: 1, kind: input, shape index: {}]   ;;  %s350_s2 = inlined_call_operand.hbm [shape: f32[8,128], index: 2, kind: input, shape index: {}]   ;;  %s351_s3 = inlined_call_operand.hbm [shape: f32[8,128], index: 3, kind: input, shape index: {}]   ;;  %s352_s4 = inlined_call_operand.hbm [shape: f32[8,128], index: 4, kind: output, shape index: {0}]   ;;  %s353_s5 = inlined_call_operand.hbm [shape: f32[1,1,1], index: 5, kind: output, shape index: {1}]  }
   0x1   :  { %13 = vsyncpa [#allocation8], 0 }
   0x2   :  { %14 = vsyncpa [#allocation6], 0 }
   0x3   :  { %15 = vsyncpa [#allocation12], 0  ;;  %s294_s18 = smov [#allocation7]   ;;  %s295_s20 = smov [#allocation4]  }
   0x4   :  { %s44_s19 = sshll.u32 %s294_s18, 4  ;;  %s29_s21 = sshll.u32 %s295_s20, 4  ;;  %s45_s19 = int_to_ptr.vmem [resolvable:$true] %s44_s19  ;;  %s30_s21 = int_to_ptr.vmem [resolvable:$true] %s29_s21 }
   0x5   :  { %s194_s22 = scalar_lea.vmem %s45_s19, 128  ;;  %p199_p1 = scmp.lt.s32.totalorder %s45_s19, %s45_s19 }
   0x6   :  { %p195_p0 = scmp.ne.s32.totalorder %s45_s19, %s194_s22  ;;  %p200_p2 = scmp.lt.s32.totalorder %s194_s22, %s194_s22 }
   0x8   :  { %p201_p3 = por %p200_p2, %p199_p1 }
   0xa   :  { %p202_p4 = pnand %p201_p3, %p195_p0 }
   0xc   :  { %205 = shalt.err (!%p202_p4)
}
   0xd   :  { %47 = dma.hbm_to_vmem [thread:$0]  %s350_s2, 128, %s45_s19, [#allocation8]  }
   0xe   :  { %s214_s25 = scalar_lea.vmem %s30_s21, 128  ;;  %p219_p6 = scmp.lt.s32.totalorder %s30_s21, %s30_s21 }
   0xf   :  { %p215_p5 = scmp.ne.s32.totalorder %s30_s21, %s214_s25  ;;  %p220_p7 = scmp.lt.s32.totalorder %s214_s25, %s214_s25 }
  0x11   :  { %p221_p8 = por %p220_p7, %p219_p6 }
  0x13   :  { %p222_p9 = pnand %p221_p8, %p215_p5 }
  0x15   :  { %225 = shalt.err (!%p222_p9)
}
  0x16   :  { %32 = dma.hbm_to_vmem [thread:$0]  %s349_s1, 128, %s30_s21, [#allocation5]  }
  0x17   :  { %s296_s28 = smov [#allocation9]  }
  0x18   :  { %s59_s29 = sshll.u32 %s296_s28, 4  ;;  %s60_s29 = int_to_ptr.vmem [resolvable:$true] %s59_s29 }
  0x19   :  { %s234_s30 = scalar_lea.vmem %s60_s29, 128  ;;  %p239_p11 = scmp.lt.s32.totalorder %s60_s29, %s60_s29 }
  0x1a   :  { %p235_p10 = scmp.ne.s32.totalorder %s60_s29, %s234_s30  ;;  %p240_p12 = scmp.lt.s32.totalorder %s234_s30, %s234_s30 }
  0x1c   :  { %p241_p13 = por %p240_p12, %p239_p11 }
  0x1e   :  { %p242_p0 = pnand %p241_p13, %p235_p10 }
  0x20   :  { %245 = shalt.err (!%p242_p0)
}
  0x21   :  { %62 = dma.hbm_to_vmem [thread:$0]  %s351_s3, 128, %s60_s29, [#allocation8]  }
  0x22   :  { %286 = dma.done.wait [#allocation5], 128  }
  0x23   :  { %287 = vsyncadd [#allocation5], 4294967168 }
  0x24   :  { %288 = dma.done.wait [#allocation8], 256  }
  0x25   :  { %289 = vsyncadd [#allocation8], 4294967040  ;;  %v297_v0 = vmov 0.0   ;;  %v89_v1 = vld [vmem:[#allocation4] sm:$0xff]  ;;  %v90_v2 = vld [vmem:[#allocation7] sm:$0xff]  ;;  %v96_v4 = vstv %s348_s0  ;;  %vm121_vm0 = vcmask 1040384  }
  0x26   :  { %88 = vst [vmem:[#allocation2] sm:$0x1] %v297_v0  ;;  %v91_v3 = vld [vmem:[#allocation9] sm:$0xff]  ;;  %v92_v5 = vadd.f32 1.0, %v89_v1  ;;  %s298_s0 = smov [#allocation10]  }
  0x27   :  { %v97_v7 = vmul.f32 %v96_v4, %v91_v3  ;;  %s146_s3 = sshll.u32 %s298_s0, 4  ;;  %s147_s3 = int_to_ptr.vmem [resolvable:$true] %s146_s3 }
  0x28   :  { %v93_v6 = vsub.f32 %v92_v5, %v90_v2  ;;  %s246_s8 = scalar_lea.vmem %s147_s3, 128  ;;  %p251_p2 = scmp.lt.s32.totalorder %s147_s3, %s147_s3 }
  0x29   :  { %p247_p1 = scmp.ne.s32.totalorder %s147_s3, %s246_s8  ;;  %p252_p3 = scmp.lt.s32.totalorder %s246_s8, %s246_s8 }
  0x2a   :  { %v94_v8 = vmax.f32 %v93_v6, 0.0 }
  0x2b   :  { %p253_p4 = por %p252_p3, %p251_p2 }
  0x2c   :  { %v98_v9 = vmul.f32 %v97_v7, %v94_v8 }
  0x2d   :  { %v106_v15 = vld [vmem:[#allocation2] sm:$0x1]  ;;  %p254_p5 = pnand %p253_p4, %p247_p1 }
  0x2e   :  { %v108_v10 = vrot.slane %v98_v9, 4  ;;  %116 = vst [vmem:[#allocation10] sm:$0xff] %v98_v9 }
  0x30   :  { %v109_v11 = vadd.f32 %v108_v10, %v98_v9 }
  0x32   :  { %v110_v12 = vrot.slane %v109_v11, 2 }
  0x34   :  { %v111_v13 = vadd.f32 %v110_v12, %v109_v11 }
  0x36   :  { %v112_v14 = vrot.slane %v111_v13, 1 }
  0x38   :  { %v113_v16 = vadd.f32 %v112_v14, %v111_v13 }
  0x3a   :  { %v114_v17 = vadd.f32 %v113_v16, %v106_v15 }
  0x3c   :  { %115 = vst [vmem:[#allocation2] sm:$0x1] %v114_v17 }
  0x43   :  { %v120_v18 = vld [vmem:[#allocation2] sm:$0x1] }
  0x44   :  { %v122_v19 = vsel %vm121_vm0, %v120_v18, 0.0 }
  0x45   :  { %123 = vadd.xlane.f32.xlu0 %v122_v19 }
  0x46   :  { %257 = shalt.err (!%p254_p5)
}
  0x47   :  { %149 = dma.vmem_to_hbm [thread:$0]  %s147_s3, 128, %s352_s4, [#allocation6]   ;;  %vm133_vm1 = vcmask 0  }
  0x48   :  { %s299_s11 = smov [#allocation11]  }
  0x49   :  { %s156_s12 = sshll.u32 %s299_s11, 4  ;;  %s157_s12 = int_to_ptr.vmem [resolvable:$true] %s156_s12 }
  0x4a   :  { %s266_s14 = scalar_lea.vmem %s157_s12, 16  ;;  %s270_s15 = scalar_lea.vmem %s157_s12, 32 }
  0x4b   :  { %p267_p6 = scmp.ne.s32.totalorder %s157_s12, %s266_s14  ;;  %p271_p7 = scmp.lt.s32.totalorder %s157_s12, %s157_s12 }
  0x4c   :  { %p272_p8 = scmp.lt.s32.totalorder %s270_s15, %s266_s14 }
  0x4e   :  { %p273_p9 = por %p272_p8, %p271_p7 }
  0x50   :  { %p274_p10 = pnand %p273_p9, %p267_p6 }
  0xce   :  { %v124_v20 = vpop.xlane.xlu0 %123 }
  0xcf   :  { %v125_v21 = vrot.slane %v124_v20, 4 }
  0xd1   :  { %v126_v22 = vadd.f32 %v125_v21, %v124_v20 }
  0xd3   :  { %v127_v23 = vrot.slane %v126_v22, 2 }
  0xd5   :  { %v128_v24 = vadd.f32 %v127_v23, %v126_v22 }
  0xd7   :  { %v129_v25 = vrot.slane %v128_v24, 1 }
  0xd9   :  { %v130_v26 = vadd.f32 %v129_v25, %v128_v24 }
  0xdb   :  { %178 = vpush %v130_v26 }
 0x10c   :  { %s179_s13 = spop %178 }
 0x10d   :  { %v132_v27 = vstv %s179_s13 }
 0x10e   :  { %134 = vst.msk [vmem:[#allocation11] sm:$0x1] %vm133_vm1, %v132_v27 }
 0x10f   :  { %277 = shalt.err (!%p274_p10)
}
 0x110   :  { %159 = dma.vmem_to_hbm [thread:$0]  %s157_s12, 16, %s353_s5, [#allocation12]  }
 0x111   :  { %290 = dma.done.wait [#allocation6], 128  }
 0x112   :  { %291 = vsyncadd [#allocation6], 4294967168 }
 0x113   :  { %292 = dma.done.wait [#allocation12], 16  }
 0x114   :  { %293 = vsyncadd [#allocation12], 4294967280 }
 0x115   :  { %166 = vsyncpa [#allocation5], 1 }
 0x116   :  { %167 = vsyncpa [#allocation8], 1 }
 0x117   :  { %168 = vsyncpa [#allocation6], 1 }
 0x118   :  { %169 = vsyncpa [#allocation12], 1 }

</bundles_post_ra>
